<compile_context>
chip_gen: v7x
topology: tpu7x:2x2x1
jax: 0.10.0
libtpu: 0.0.40
codegen_flags: <defaults>
</compile_context>

<pallas_src>
import jax
import jax.numpy as jnp
from jax.experimental import pallas as pl
from jax.experimental.pallas import tpu as pltpu

# ----------------------- synthetic EfficientDet config ----------------------
NUM_LEVELS = 3
NUM_CLASSES = 4
NUM_ANCHORS = 3            # anchors per spatial location (num_scales * aspects)
STEM_CH = 16
IN_CH = 3
IMG_SIZE = 32
MIN_STRIDE = 8             # stride of level l is MIN_STRIDE * 2**l

N_CLS = NUM_ANCHORS * NUM_CLASSES   # 12 class-head channels per location
N_BOX = NUM_ANCHORS * 4             # 12 box-head channels per location

# DetectionLoss defaults (effdet)
ALPHA = 0.25
GAMMA = 1.5                # modulating factor exponent (1.5 == u * sqrt(u))
DELTA = 0.1
BOX_LOSS_WEIGHT = 50.0
LABEL_SMOOTHING = 0.0

MAX_TILE_M = 1024          # row tile for the fused grid (per-tile VMEM ~ 0.2 MiB)
VMEM_LIMIT = 32 * 1024 * 1024


def _round_up(a, b):
    return (a + b - 1) // b * b


# ----------------------- fused heads + detection-loss kernel -----------------
def _fused_head_loss_kernel(feat_ref, ws_ref, bs_ref, wc_ref, bc_ref,
                            wb_ref, bb_ref, ctgt_ref, btgt_ref,
                            cls_out_ref, box_out_ref):
    i = pl.program_id(0)

    @pl.when(i == 0)
    def _():
        cls_out_ref[...] = jnp.zeros_like(cls_out_ref)
        box_out_ref[...] = jnp.zeros_like(box_out_ref)

    # ---- heads: stem 1x1 conv (ReLU) -> class / box 1x1 convs, all in VMEM --
    hid = jnp.dot(feat_ref[...], ws_ref[...], preferred_element_type=jnp.float32)
    hid = jnp.maximum(hid + bs_ref[...], 0.0)
    logits = jnp.dot(hid, wc_ref[...], preferred_element_type=jnp.float32) + bc_ref[...]
    bpred = jnp.dot(hid, wb_ref[...], preferred_element_type=jnp.float32) + bb_ref[...]

    # ---------------- focal classification loss ("new_focal_loss") -----------
    t_int = ctgt_ref[...]                          # (tile_m, A*NC) int32 class id per slot
    lane = jax.lax.broadcasted_iota(jnp.int32, logits.shape, dimension=1)
    cls_idx = lane % NUM_CLASSES                   # class index of each column
    t = (t_int == cls_idx).astype(jnp.float32)     # one-hot built in-kernel
    valid = (t_int != -2).astype(jnp.float32)      # ignore mask (-2 == ignore / pad)

    x = logits
    e = jnp.exp(-jnp.abs(x))                       # single exp feeds sigmoid + BCE
    inv = pl.reciprocal(1.0 + e, approx=True)
    p = jnp.where(x >= 0, inv, e * inv)            # sigmoid(x), numerically stable
    p_t = t * p + (1.0 - t) * (1.0 - p)
    alpha_factor = t * ALPHA + (1.0 - t) * (1.0 - ALPHA)
    u = jnp.maximum(1.0 - p_t, 0.0)
    modulating = u * jnp.sqrt(u)                   # (1 - p_t) ** 1.5
    tt = t
    if LABEL_SMOOTHING > 0.0:
        tt = t * (1.0 - LABEL_SMOOTHING) + 0.5 * LABEL_SMOOTHING
    ce = jnp.maximum(x, 0.0) - x * tt + jnp.log1p(e)   # stable BCE with logits
    cls_out_ref[...] += jnp.sum(alpha_factor * modulating * ce * valid)

    # ----------------------------- huber box loss ----------------------------
    bt = btgt_ref[...]
    bmask = (bt != 0.0).astype(jnp.float32)        # zero target == unmatched / pad
    abs_err = jnp.abs(bpred - bt)
    quad = jnp.minimum(abs_err, DELTA)
    lin = abs_err - quad
    box_out_ref[...] += jnp.sum((0.5 * quad * quad + DELTA * lin) * bmask)


def fused_head_loss_sums(feat_all, ctgt_all, btgt_all, params):
    """feat_all: (M, IN_CH), ctgt_all: (M, A*NC) int32, btgt_all: (M, A*4) f32.
    Returns (cls_sum, box_sum) scalars (unnormalized)."""
    m = feat_all.shape[0]
    tile_m = min(MAX_TILE_M, _round_up(m, 8))
    m_pad = _round_up(m, tile_m)
    if m_pad != m:
        pad = m_pad - m
        feat_all = jnp.pad(feat_all, ((0, pad), (0, 0)))
        ctgt_all = jnp.pad(ctgt_all, ((0, pad), (0, 0)), constant_values=-2)
        btgt_all = jnp.pad(btgt_all, ((0, pad), (0, 0)))

    out_spec = pl.BlockSpec((1, 1), lambda i: (0, 0))
    cls_sum, box_sum = pl.pallas_call(
        _fused_head_loss_kernel,
        out_shape=(jax.ShapeDtypeStruct((1, 1), jnp.float32),
                   jax.ShapeDtypeStruct((1, 1), jnp.float32)),
        grid=(m_pad // tile_m,),
        in_specs=[
            pl.BlockSpec((tile_m, IN_CH), lambda i: (i, 0)),
            pl.BlockSpec((IN_CH, STEM_CH), lambda i: (0, 0)),
            pl.BlockSpec((1, STEM_CH), lambda i: (0, 0)),
            pl.BlockSpec((STEM_CH, N_CLS), lambda i: (0, 0)),
            pl.BlockSpec((1, N_CLS), lambda i: (0, 0)),
            pl.BlockSpec((STEM_CH, N_BOX), lambda i: (0, 0)),
            pl.BlockSpec((1, N_BOX), lambda i: (0, 0)),
            pl.BlockSpec((tile_m, N_CLS), lambda i: (i, 0)),
            pl.BlockSpec((tile_m, N_BOX), lambda i: (i, 0)),
        ],
        out_specs=(out_spec, out_spec),
        compiler_params=pltpu.CompilerParams(
            dimension_semantics=("arbitrary",),       # accumulates into the scalars
            vmem_limit_bytes=VMEM_LIMIT),
    )(feat_all,
      params["w_stem"], params["b_stem"].reshape(1, -1),
      params["w_cls"], params["b_cls"].reshape(1, -1),
      params["w_box"], params["b_box"].reshape(1, -1),
      ctgt_all, btgt_all)
    return cls_sum[0, 0], box_sum[0, 0]


# ------------------------------- model params --------------------------------
def init_params(key):
    k1, k2, k3 = jax.random.split(key, 3)
    return {
        "w_stem": jax.random.normal(k1, (IN_CH, STEM_CH), jnp.float32) * 0.1,
        "b_stem": jnp.zeros((STEM_CH,), jnp.float32),
        "w_cls": jax.random.normal(k2, (STEM_CH, N_CLS), jnp.float32) * 0.1,
        # classification prior of 0.01, as in RetinaNet/EfficientDet heads
        "b_cls": jnp.full((N_CLS,), -4.59512, jnp.float32),
        "w_box": jax.random.normal(k3, (STEM_CH, N_BOX), jnp.float32) * 0.1,
        "b_box": jnp.zeros((N_BOX,), jnp.float32),
    }


def _pool_features(x):
    """Tiny EfficientDet-like backbone glue: per-level strided average pooling
    of the NCHW image down to the level-l resolution, flattened to NHWC rows
    and concatenated over levels.  Returns (M, IN_CH)."""
    b, c, h, w = x.shape
    feats = []
    for l in range(NUM_LEVELS):
        s = MIN_STRIDE * (2 ** l)
        hl, wl = h // s, w // s
        feat = x.reshape(b, c, hl, s, wl, s).mean(axis=(3, 5))        # (B,C,hl,wl)
        feat = jnp.transpose(feat, (0, 2, 3, 1)).reshape(b * hl * wl, c)
        feats.append(feat)
    return jnp.concatenate(feats, axis=0)


# ---------------------------- DetBenchTrain.forward ---------------------------
def det_bench_train_forward(params, x, target):
    # anchor_labeler is None path: targets supplied directly.
    # TODO(synk): AnchorLabeler.batch_label_anchors (IoU box matching) has no
    # clean Pallas equivalent here; the precomputed-target path is used instead.
    ctgt_list, btgt_list = [], []
    for l in range(NUM_LEVELS):
        ct = target[f"label_cls_{l}"].reshape(-1, NUM_ANCHORS).astype(jnp.int32)
        # one per-anchor class id per class slot, matching the head's
        # anchor-major / class-minor channel layout
        ctgt_list.append(jnp.repeat(ct, NUM_CLASSES, axis=1))          # (rows_l, A*NC)
        btgt_list.append(
            target[f"label_bbox_{l}"].reshape(-1, N_BOX).astype(jnp.float32))
    num_positives = target["label_num_positives"]
    num_positives_sum = jnp.sum(num_positives) + 1.0

    feat_all = _pool_features(x)                                       # (M, IN_CH)
    ctgt_all = jnp.concatenate(ctgt_list, axis=0)                      # (M, A*NC)
    btgt_all = jnp.concatenate(btgt_list, axis=0)                      # (M, A*4)

    cls_sum, box_sum = fused_head_loss_sums(feat_all, ctgt_all, btgt_all, params)

    cls_loss = cls_sum / num_positives_sum
    box_loss = box_sum / (num_positives_sum * 4.0)
    loss = cls_loss + BOX_LOSS_WEIGHT * box_loss
    # TODO(synk): eval-mode _post_process/_batch_detection (top-k + NMS) not
    # implemented; training-mode output only.
    return {"loss": loss, "cls_loss": cls_loss, "box_loss": box_loss}


# ------------------------------------ main ------------------------------------
if __name__ == "__main__":
    key = jax.random.PRNGKey(0)
    kx, kp, *klvl = jax.random.split(key, 2 + 2 * NUM_LEVELS)

    B = 2
    x = jax.random.normal(kx, (B, IN_CH, IMG_SIZE, IMG_SIZE), jnp.float32)
    params = init_params(kp)

    target = {}
    pos_count = jnp.zeros((B,), jnp.float32)
    for l in range(NUM_LEVELS):
        s = MIN_STRIDE * (2 ** l)
        hl = wl = IMG_SIZE // s
        kc, kb = klvl[2 * l], klvl[2 * l + 1]
        # class targets in {-2 (ignore), -1 (background), 0..NUM_CLASSES-1}
        cls_t = jax.random.randint(kc, (B, hl, wl, NUM_ANCHORS), -2, NUM_CLASSES)
        box_t = jax.random.normal(kb, (B, hl, wl, NUM_ANCHORS * 4), jnp.float32)
        target[f"label_cls_{l}"] = cls_t.astype(jnp.int32)
        target[f"label_bbox_{l}"] = box_t
        pos_count = pos_count + jnp.sum((cls_t >= 0).astype(jnp.float32),
                                        axis=(1, 2, 3))
    target["label_num_positives"] = pos_count

    fwd = jax.jit(det_bench_train_forward)
    out = fwd(params, x, target)
    out = jax.tree_util.tree_map(jax.block_until_ready, out)
    assert jnp.isfinite(out["loss"]) and jnp.isfinite(out["cls_loss"]) \
        and jnp.isfinite(out["box_loss"])
    print("KERNEL_OK")
</pallas_src>

<mosaic_0001>
module attributes {stable_mosaic.version = 11 : i64} {
  func.func @_fused_head_loss_kernel(%arg0: i32, %arg1: memref<48x3xf32, #tpu.memory_space<vmem>>, %arg2: memref<3x16xf32, #tpu.memory_space<vmem>>, %arg3: memref<1x16xf32, #tpu.memory_space<vmem>>, %arg4: memref<16x12xf32, #tpu.memory_space<vmem>>, %arg5: memref<1x12xf32, #tpu.memory_space<vmem>>, %arg6: memref<16x12xf32, #tpu.memory_space<vmem>>, %arg7: memref<1x12xf32, #tpu.memory_space<vmem>>, %arg8: memref<48x12xi32, #tpu.memory_space<vmem>>, %arg9: memref<48x12xf32, #tpu.memory_space<vmem>>, %arg10: memref<1x1xf32, #tpu.memory_space<vmem>>, %arg11: memref<1x1xf32, #tpu.memory_space<vmem>>) attributes {dimension_semantics = [#tpu.dimension_semantics<arbitrary>], iteration_bounds = array<i64: 1>, scalar_prefetch = 0 : i64, scratch_operands = 0 : i64, tpu.core_type = #tpu.core_type<tc>, window_params = [{transform_indices = @transform_0, window_bounds = array<i64: 48, 3>}, {pipeline_mode = #tpu.pipeline_mode<synchronous>, transform_indices = @transform_1, window_bounds = array<i64: 3, 16>}, {pipeline_mode = #tpu.pipeline_mode<synchronous>, transform_indices = @transform_2, window_bounds = array<i64: 1, 16>}, {pipeline_mode = #tpu.pipeline_mode<synchronous>, transform_indices = @transform_3, window_bounds = array<i64: 16, 12>}, {pipeline_mode = #tpu.pipeline_mode<synchronous>, transform_indices = @transform_4, window_bounds = array<i64: 1, 12>}, {pipeline_mode = #tpu.pipeline_mode<synchronous>, transform_indices = @transform_5, window_bounds = array<i64: 16, 12>}, {pipeline_mode = #tpu.pipeline_mode<synchronous>, transform_indices = @transform_6, window_bounds = array<i64: 1, 12>}, {transform_indices = @transform_7, window_bounds = array<i64: 48, 12>}, {transform_indices = @transform_8, window_bounds = array<i64: 48, 12>}, {pipeline_mode = #tpu.pipeline_mode<synchronous>, transform_indices = @transform_9, window_bounds = array<i64: 1, 1>}, {pipeline_mode = #tpu.pipeline_mode<synchronous>, transform_indices = @transform_10, window_bounds = array<i64: 1, 1>}]} {
    %c0_i32 = arith.constant 0 : i32
    %0 = arith.cmpi eq, %arg0, %c0_i32 : i32
    %1 = arith.extui %0 : i1 to i32
    %c0_i32_0 = arith.constant 0 : i32
    %2 = arith.cmpi ne, %1, %c0_i32_0 : i32
    scf.if %2 {
      %cst_50 = arith.constant 0.000000e+00 : f32
      %119 = vector.broadcast %cst_50 : f32 to vector<1x1xf32>
      %c0_51 = arith.constant 0 : index
      %c0_52 = arith.constant 0 : index
      %120 = vector.load %arg10[%c0_51, %c0_52] : memref<1x1xf32, #tpu.memory_space<vmem>>, vector<1x1xf32>
      tpu.vector_store %arg10[%c0_51, %c0_52], %119 {strides = array<i32>} : memref<1x1xf32, #tpu.memory_space<vmem>>, vector<1x1xf32>,
      %cst_53 = arith.constant 0.000000e+00 : f32
      %121 = vector.broadcast %cst_53 : f32 to vector<1x1xf32>
      %c0_54 = arith.constant 0 : index
      %c0_55 = arith.constant 0 : index
      %122 = vector.load %arg11[%c0_54, %c0_55] : memref<1x1xf32, #tpu.memory_space<vmem>>, vector<1x1xf32>
      tpu.vector_store %arg11[%c0_54, %c0_55], %121 {strides = array<i32>} : memref<1x1xf32, #tpu.memory_space<vmem>>, vector<1x1xf32>,
    } else {
    }
    %c0 = arith.constant 0 : index
    %c0_1 = arith.constant 0 : index
    %3 = vector.load %arg1[%c0, %c0_1] : memref<48x3xf32, #tpu.memory_space<vmem>>, vector<48x3xf32>
    %c0_2 = arith.constant 0 : index
    %c0_3 = arith.constant 0 : index
    %4 = vector.load %arg2[%c0_2, %c0_3] : memref<3x16xf32, #tpu.memory_space<vmem>>, vector<3x16xf32>
    %cst = arith.constant dense<0.000000e+00> : vector<48x16xf32>
    %5 = tpu.matmul %3, %4, %cst {dimension_numbers = #tpu.dot_dimension_numbers<[1], [0], [0], [1], [0, 0, 1, 1], [], []>} : vector<48x3xf32>, vector<3x16xf32>, vector<48x16xf32> -> vector<48x16xf32>
    %c0_4 = arith.constant 0 : index
    %c0_5 = arith.constant 0 : index
    %6 = vector.load %arg3[%c0_4, %c0_5] : memref<1x16xf32, #tpu.memory_space<vmem>>, vector<1x16xf32>
    %7 = vector.broadcast %6 : vector<1x16xf32> to vector<48x16xf32>
    %8 = arith.addf %5, %7 : vector<48x16xf32>
    %cst_6 = arith.constant 0.000000e+00 : f32
    %9 = vector.broadcast %cst_6 : f32 to vector<48x16xf32>
    %10 = arith.maximumf %8, %9 : vector<48x16xf32>
    %c0_7 = arith.constant 0 : index
    %c0_8 = arith.constant 0 : index
    %11 = vector.load %arg4[%c0_7, %c0_8] : memref<16x12xf32, #tpu.memory_space<vmem>>, vector<16x12xf32>
    %cst_9 = arith.constant dense<0.000000e+00> : vector<48x12xf32>
    %12 = tpu.matmul %10, %11, %cst_9 {dimension_numbers = #tpu.dot_dimension_numbers<[1], [0], [0], [1], [0, 0, 1, 1], [], []>} : vector<48x16xf32>, vector<16x12xf32>, vector<48x12xf32> -> vector<48x12xf32>
    %c0_10 = arith.constant 0 : index
    %c0_11 = arith.constant 0 : index
    %13 = vector.load %arg5[%c0_10, %c0_11] : memref<1x12xf32, #tpu.memory_space<vmem>>, vector<1x12xf32>
    %14 = vector.broadcast %13 : vector<1x12xf32> to vector<48x12xf32>
    %15 = arith.addf %12, %14 : vector<48x12xf32>
    %c0_12 = arith.constant 0 : index
    %c0_13 = arith.constant 0 : index
    %16 = vector.load %arg6[%c0_12, %c0_13] : memref<16x12xf32, #tpu.memory_space<vmem>>, vector<16x12xf32>
    %cst_14 = arith.constant dense<0.000000e+00> : vector<48x12xf32>
    %17 = tpu.matmul %10, %16, %cst_14 {dimension_numbers = #tpu.dot_dimension_numbers<[1], [0], [0], [1], [0, 0, 1, 1], [], []>} : vector<48x16xf32>, vector<16x12xf32>, vector<48x12xf32> -> vector<48x12xf32>
    %c0_15 = arith.constant 0 : index
    %c0_16 = arith.constant 0 : index
    %18 = vector.load %arg7[%c0_15, %c0_16] : memref<1x12xf32, #tpu.memory_space<vmem>>, vector<1x12xf32>
    %19 = vector.broadcast %18 : vector<1x12xf32> to vector<48x12xf32>
    %20 = arith.addf %17, %19 : vector<48x12xf32>
    %c0_17 = arith.constant 0 : index
    %c0_18 = arith.constant 0 : index
    %21 = vector.load %arg8[%c0_17, %c0_18] : memref<48x12xi32, #tpu.memory_space<vmem>>, vector<48x12xi32>
    %22 = tpu.iota {dimensions = array<i32: 1>} : vector<48x12xi32>
    %c4_i32 = arith.constant 4 : i32
    %c0_i32_19 = arith.constant 0 : i32
    %23 = arith.cmpi eq, %c4_i32, %c0_i32_19 : i32
    %c1_i32 = arith.constant 1 : i32
    %24 = arith.select %23, %c1_i32, %c4_i32 : i32
    %25 = vector.broadcast %24 : i32 to vector<48x12xi32>
    %26 = arith.remsi %22, %25 : vector<48x12xi32>
    %c0_i32_20 = arith.constant 0 : i32
    %27 = vector.broadcast %c0_i32_20 : i32 to vector<48x12xi32>
    %28 = arith.cmpi ne, %26, %27 : vector<48x12xi32>
    %c0_i32_21 = arith.constant 0 : i32
    %29 = vector.broadcast %c0_i32_21 : i32 to vector<48x12xi32>
    %30 = arith.cmpi slt, %26, %29 : vector<48x12xi32>
    %c0_i32_22 = arith.constant 0 : i32
    %31 = arith.cmpi slt, %24, %c0_i32_22 : i32
    %32 = vector.broadcast %31 : i1 to vector<48x12xi1>
    %33 = vector.broadcast %32 : vector<48x12xi1> to vector<48x12xi1>
    %34 = arith.xori %30, %33 : vector<48x12xi1>
    %35 = arith.andi %34, %28 : vector<48x12xi1>
    %36 = vector.broadcast %24 : i32 to vector<48x12xi32>
    %37 = arith.addi %26, %36 : vector<48x12xi32>
    %38 = arith.select %35, %37, %26 : vector<48x12xi1>, vector<48x12xi32>
    %39 = arith.cmpi eq, %21, %38 : vector<48x12xi32>
    %40 = arith.extui %39 : vector<48x12xi1> to vector<48x12xi32>
    %41 = arith.sitofp %40 : vector<48x12xi32> to vector<48x12xf32>
    %c-2_i32 = arith.constant -2 : i32
    %42 = vector.broadcast %c-2_i32 : i32 to vector<48x12xi32>
    %43 = arith.cmpi ne, %21, %42 : vector<48x12xi32>
    %44 = arith.extui %43 : vector<48x12xi1> to vector<48x12xi32>
    %45 = arith.sitofp %44 : vector<48x12xi32> to vector<48x12xf32>
    %46 = math.absf %15 : vector<48x12xf32>
    %cst_23 = arith.constant 0.000000e+00 : f32
    %47 = vector.broadcast %cst_23 : f32 to vector<48x12xf32>
    %48 = arith.subf %47, %46 : vector<48x12xf32>
    %49 = math.exp %48 : vector<48x12xf32>
    %cst_24 = arith.constant 1.000000e+00 : f32
    %50 = vector.broadcast %cst_24 : f32 to vector<48x12xf32>
    %51 = arith.addf %50, %49 : vector<48x12xf32>
    %52 = tpu.reciprocal %51 {approx = true} : vector<48x12xf32> -> vector<48x12xf32>
    %cst_25 = arith.constant 0.000000e+00 : f32
    %53 = vector.broadcast %cst_25 : f32 to vector<48x12xf32>
    %54 = arith.cmpf oge, %15, %53 : vector<48x12xf32>
    %55 = arith.mulf %49, %52 : vector<48x12xf32>
    %56 = arith.select %54, %52, %55 : vector<48x12xi1>, vector<48x12xf32>
    %57 = arith.mulf %41, %56 : vector<48x12xf32>
    %cst_26 = arith.constant 1.000000e+00 : f32
    %58 = vector.broadcast %cst_26 : f32 to vector<48x12xf32>
    %59 = arith.subf %58, %41 : vector<48x12xf32>
    %cst_27 = arith.constant 1.000000e+00 : f32
    %60 = vector.broadcast %cst_27 : f32 to vector<48x12xf32>
    %61 = arith.subf %60, %56 : vector<48x12xf32>
    %62 = arith.mulf %59, %61 : vector<48x12xf32>
    %63 = arith.addf %57, %62 : vector<48x12xf32>
    %cst_28 = arith.constant 2.500000e-01 : f32
    %64 = vector.broadcast %cst_28 : f32 to vector<48x12xf32>
    %65 = arith.mulf %41, %64 : vector<48x12xf32>
    %cst_29 = arith.constant 1.000000e+00 : f32
    %66 = vector.broadcast %cst_29 : f32 to vector<48x12xf32>
    %67 = arith.subf %66, %41 : vector<48x12xf32>
    %cst_30 = arith.constant 7.500000e-01 : f32
    %68 = vector.broadcast %cst_30 : f32 to vector<48x12xf32>
    %69 = arith.mulf %67, %68 : vector<48x12xf32>
    %70 = arith.addf %65, %69 : vector<48x12xf32>
    %cst_31 = arith.constant 1.000000e+00 : f32
    %71 = vector.broadcast %cst_31 : f32 to vector<48x12xf32>
    %72 = arith.subf %71, %63 : vector<48x12xf32>
    %cst_32 = arith.constant 0.000000e+00 : f32
    %73 = vector.broadcast %cst_32 : f32 to vector<48x12xf32>
    %74 = arith.maximumf %72, %73 : vector<48x12xf32>
    %75 = math.sqrt %74 : vector<48x12xf32>
    %76 = arith.mulf %74, %75 : vector<48x12xf32>
    %cst_33 = arith.constant 0.000000e+00 : f32
    %77 = vector.broadcast %cst_33 : f32 to vector<48x12xf32>
    %78 = arith.maximumf %15, %77 : vector<48x12xf32>
    %79 = arith.mulf %15, %41 : vector<48x12xf32>
    %80 = arith.subf %78, %79 : vector<48x12xf32>
    %81 = math.log1p %49 : vector<48x12xf32>
    %82 = arith.addf %80, %81 : vector<48x12xf32>
    %c0_34 = arith.constant 0 : index
    %c0_35 = arith.constant 0 : index
    %83 = vector.load %arg10[%c0_34, %c0_35] : memref<1x1xf32, #tpu.memory_space<vmem>>, vector<1x1xf32>
    %84 = arith.mulf %70, %76 : vector<48x12xf32>
    %85 = arith.mulf %84, %82 : vector<48x12xf32>
    %86 = arith.mulf %85, %45 : vector<48x12xf32>
    %87 = vector.shape_cast %86 : vector<48x12xf32> to vector<1x48x12xf32>
    %cst_36 = arith.constant dense<0.000000e+00> : vector<1xf32>
    %88 = vector.multi_reduction <add>, %87, %cst_36 [1, 2] : vector<1x48x12xf32> to vector<1xf32>
    %89 = vector.shape_cast %88 : vector<1xf32> to vector<1x1x1xf32>
    %90 = vector.extract %89[0, 0, 0] : f32 from vector<1x1x1xf32>
    %91 = vector.broadcast %90 : f32 to vector<1x1xf32>
    %92 = arith.addf %83, %91 : vector<1x1xf32>
    %c0_37 = arith.constant 0 : index
    %c0_38 = arith.constant 0 : index
    %93 = vector.load %arg10[%c0_37, %c0_38] : memref<1x1xf32, #tpu.memory_space<vmem>>, vector<1x1xf32>
    tpu.vector_store %arg10[%c0_37, %c0_38], %92 {strides = array<i32>} : memref<1x1xf32, #tpu.memory_space<vmem>>, vector<1x1xf32>,
    %c0_39 = arith.constant 0 : index
    %c0_40 = arith.constant 0 : index
    %94 = vector.load %arg9[%c0_39, %c0_40] : memref<48x12xf32, #tpu.memory_space<vmem>>, vector<48x12xf32>
    %cst_41 = arith.constant 0.000000e+00 : f32
    %95 = vector.broadcast %cst_41 : f32 to vector<48x12xf32>
    %96 = arith.cmpf one, %94, %95 : vector<48x12xf32>
    %97 = arith.extui %96 : vector<48x12xi1> to vector<48x12xi32>
    %98 = arith.sitofp %97 : vector<48x12xi32> to vector<48x12xf32>
    %99 = arith.subf %20, %94 : vector<48x12xf32>
    %100 = math.absf %99 : vector<48x12xf32>
    %cst_42 = arith.constant 1.000000e-01 : f32
    %101 = vector.broadcast %cst_42 : f32 to vector<48x12xf32>
    %102 = arith.minimumf %100, %101 : vector<48x12xf32>
    %103 = arith.subf %100, %102 : vector<48x12xf32>
    %c0_43 = arith.constant 0 : index
    %c0_44 = arith.constant 0 : index
    %104 = vector.load %arg11[%c0_43, %c0_44] : memref<1x1xf32, #tpu.memory_space<vmem>>, vector<1x1xf32>
    %cst_45 = arith.constant 5.000000e-01 : f32
    %105 = vector.broadcast %cst_45 : f32 to vector<48x12xf32>
    %106 = arith.mulf %105, %102 : vector<48x12xf32>
    %107 = arith.mulf %106, %102 : vector<48x12xf32>
    %cst_46 = arith.constant 1.000000e-01 : f32
    %108 = vector.broadcast %cst_46 : f32 to vector<48x12xf32>
    %109 = arith.mulf %108, %103 : vector<48x12xf32>
    %110 = arith.addf %107, %109 : vector<48x12xf32>
    %111 = arith.mulf %110, %98 : vector<48x12xf32>
    %112 = vector.shape_cast %111 : vector<48x12xf32> to vector<1x48x12xf32>
    %cst_47 = arith.constant dense<0.000000e+00> : vector<1xf32>
    %113 = vector.multi_reduction <add>, %112, %cst_47 [1, 2] : vector<1x48x12xf32> to vector<1xf32>
    %114 = vector.shape_cast %113 : vector<1xf32> to vector<1x1x1xf32>
    %115 = vector.extract %114[0, 0, 0] : f32 from vector<1x1x1xf32>
    %116 = vector.broadcast %115 : f32 to vector<1x1xf32>
    %117 = arith.addf %104, %116 : vector<1x1xf32>
    %c0_48 = arith.constant 0 : index
    %c0_49 = arith.constant 0 : index
    %118 = vector.load %arg11[%c0_48, %c0_49] : memref<1x1xf32, #tpu.memory_space<vmem>>, vector<1x1xf32>
    tpu.vector_store %arg11[%c0_48, %c0_49], %117 {strides = array<i32>} : memref<1x1xf32, #tpu.memory_space<vmem>>, vector<1x1xf32>,
    return
  }
  func.func @transform_0(%arg0: i32) -> (i32, i32) {
    %c0_i32 = arith.constant 0 : i32
    %c0_i32_0 = arith.constant 0 : i32
    return %arg0, %c0_i32 : i32, i32
  }
  func.func @transform_1(%arg0: i32) -> (i32, i32) {
    %c0_i32 = arith.constant 0 : i32
    %c0_i32_0 = arith.constant 0 : i32
    %c0_i32_1 = arith.constant 0 : i32
    return %c0_i32, %c0_i32_0 : i32, i32
  }
  func.func @transform_2(%arg0: i32) -> (i32, i32) {
    %c0_i32 = arith.constant 0 : i32
    %c0_i32_0 = arith.constant 0 : i32
    %c0_i32_1 = arith.constant 0 : i32
    return %c0_i32, %c0_i32_0 : i32, i32
  }
  func.func @transform_3(%arg0: i32) -> (i32, i32) {
    %c0_i32 = arith.constant 0 : i32
    %c0_i32_0 = arith.constant 0 : i32
    %c0_i32_1 = arith.constant 0 : i32
    return %c0_i32, %c0_i32_0 : i32, i32
  }
  func.func @transform_4(%arg0: i32) -> (i32, i32) {
    %c0_i32 = arith.constant 0 : i32
    %c0_i32_0 = arith.constant 0 : i32
    %c0_i32_1 = arith.constant 0 : i32
    return %c0_i32, %c0_i32_0 : i32, i32
  }
  func.func @transform_5(%arg0: i32) -> (i32, i32) {
    %c0_i32 = arith.constant 0 : i32
    %c0_i32_0 = arith.constant 0 : i32
    %c0_i32_1 = arith.constant 0 : i32
    return %c0_i32, %c0_i32_0 : i32, i32
  }
  func.func @transform_6(%arg0: i32) -> (i32, i32) {
    %c0_i32 = arith.constant 0 : i32
    %c0_i32_0 = arith.constant 0 : i32
    %c0_i32_1 = arith.constant 0 : i32
    return %c0_i32, %c0_i32_0 : i32, i32
  }
  func.func @transform_7(%arg0: i32) -> (i32, i32) {
    %c0_i32 = arith.constant 0 : i32
    %c0_i32_0 = arith.constant 0 : i32
    return %arg0, %c0_i32 : i32, i32
  }
  func.func @transform_8(%arg0: i32) -> (i32, i32) {
    %c0_i32 = arith.constant 0 : i32
    %c0_i32_0 = arith.constant 0 : i32
    return %arg0, %c0_i32 : i32, i32
  }
  func.func @transform_9(%arg0: i32) -> (i32, i32) {
    %c0_i32 = arith.constant 0 : i32
    %c0_i32_0 = arith.constant 0 : i32
    %c0_i32_1 = arith.constant 0 : i32
    return %c0_i32, %c0_i32_0 : i32, i32
  }
  func.func @transform_10(%arg0: i32) -> (i32, i32) {
    %c0_i32 = arith.constant 0 : i32
    %c0_i32_0 = arith.constant 0 : i32
    %c0_i32_1 = arith.constant 0 : i32
    return %c0_i32, %c0_i32_0 : i32, i32
  }
}

</mosaic_0001>

<bundles_post_ra>
// kernel: det_bench_train_forward.1
= control target key start
LH: loop header
LB: loop body
LE: loop exit
PB: predicated region body
PF: predicated region fallthrough
CT: control target
= control target key end

     0   :  { %16 = vsyncpa [#allocation3], 0  ;;  %vm76_vm0 = vcmask 1042432   ;;  %vm57_vm1 = vcmask 23552   ;;  %s1729_s0 = inlined_call_operand.vmem [shape: f32[48,3], index: 0, kind: input, shape index: {}]   ;;  %s1730_s1 = inlined_call_operand.vmem [shape: f32[3,16], index: 1, kind: input, shape index: {}]   ;;  %s1731_s2 = inlined_call_operand.vmem [shape: f32[1,16], index: 2, kind: input, shape index: {}]   ;;  %s1732_s3 = inlined_call_operand.vmem [shape: f32[16,12], index: 3, kind: input, shape index: {}]   ;;  %s1733_s4 = inlined_call_operand.vmem [shape: f32[1,12], index: 4, kind: input, shape index: {}]   ;;  %s1734_s5 = inlined_call_operand.vmem [shape: f32[16,12], index: 5, kind: input, shape index: {}]   ;;  %s1735_s6 = inlined_call_operand.vmem [shape: f32[1,12], index: 6, kind: input, shape index: {}]   ;;  %s1736_s7 = inlined_call_operand.vmem [shape: s32[48,12], index: 7, kind: input, shape index: {}]   ;;  %s1737_s8 = inlined_call_operand.vmem [shape: f32[48,12], index: 8, kind: input, shape index: {}]   ;;  %s1738_s9 = inlined_call_operand.hbm [shape: f32[1,1], index: 9, kind: output, shape index: {0}]   ;;  %s1739_s10 = inlined_call_operand.hbm [shape: f32[1,1], index: 10, kind: output, shape index: {1}]  }
   0x1   :  { %v49_v0 = vld [vmem:[%s1730_s1] sm:$0x7]  ;;  %v44_v2 = vld [vmem:[%s1729_s0 + $0x8] sm:$0xff]  ;;  %v45_v3 = vld [vmem:[%s1729_s0 + $0x10] sm:$0xff] }
   0x2   :  { %v43_v1 = vld [vmem:[%s1729_s0] sm:$0xff]  ;;  %941 = vmatprep.subr.msk.mxu0 %vm76_vm0, %v49_v0  ;;  %986 = vmatprep.subr.msk.mxu1 %vm76_vm0, %v49_v0  ;;  %v46_v4 = vld [vmem:[%s1729_s0 + $0x18] sm:$0xff]  ;;  %v182_v6 = vld [vmem:[%s1732_s3 + $0x8] sm:$0xff] }
   0x3   :  { %943 = vmatprep.mubr.msk.f32.mxu0 %vm57_vm1, %v43_v1  ;;  %942 = vmatpush3.msk.msra.mxu0 %vm76_vm0, %v49_v0  ;;  %v181_v5 = vld [vmem:[%s1732_s3] sm:$0xff] }
   0x4   :  { %944 = vmatmul.mubr.msk.f32.vlgmr.msra.gmra.mrb[0].mxu0 %vm57_vm1, %v44_v2  ;;  %987 = vmatpush3.msk.msra.mxu1 %vm76_vm0, %v49_v0  ;;  %v47_v7 = vld [vmem:[%s1729_s0 + $0x20] sm:$0xff]  ;;  %v978_v8 = vpack.c.bf16 %v182_v6, %v181_v5 }
   0x5   :  { %17 = vsyncpa [#allocation5], 0  ;;  %946 = vmatprep.mubr.msk.f32.mxu1 %vm57_vm1, %v45_v3  ;;  %v48_v9 = vld [vmem:[%s1729_s0 + $0x28] sm:$0xff]  ;;  %v304_v10 = vld [vmem:[%s1734_s5] sm:$0xff]  ;;  %vm190_vm2 = vcmask 130048   ;;  %v414_v32 = vlaneseq  ;;  %v1740_v41 = vmov 0.0  }
   0x6   :  { %947 = vmatmul.mubr.msk.f32.vlgmr.msra.gmra.mrb[0].mxu1 %vm57_vm1, %v46_v4  ;;  %979 = vmatprep.subr.bf16.mxu1 %v978_v8  ;;  %v305_v11 = vld [vmem:[%s1734_s5 + $0x8] sm:$0xff]  ;;  %v878_v13 = vld [vmem:[%s1731_s2] ss:$0 sm:$0xff]  ;;  %v1218_v37 = vld [vmem:[%s1736_s7 + $0x18] sm:$0xff]  ;;  %s1093_s5 = smov [#allocation4]  }
   0x7   :  { %949 = vmatprep.mubr.msk.f32.mxu1 %vm57_vm1, %v47_v7  ;;  %981 = vmatpush3.bf16.msra.mxu1 %v978_v8  ;;  %v982_v12 = vpack.c.bf16 %v305_v11, %v304_v10  ;;  %v415_v33 = vand.u32 127, %v414_v32  ;;  %v1206_v35 = vld [vmem:[%s1736_s7 + $0x8] sm:$0xff]  ;;  %v1211_v36 = vld [vmem:[%s1736_s7] sm:$0xff]  ;;  %v1223_v38 = vld [vmem:[%s1736_s7 + $0x10] sm:$0xff]  ;;  %s866_s15 = sshll.u32 %s1093_s5, 4  ;;  %s867_s15 = int_to_ptr.vmem [resolvable:$true] %s866_s15 }
   0x8   :  { %v1228_v39 = vld [vmem:[%s1733_s4] ss:$0 sm:$0xff]  ;;  %v749_v43 = vld [vmem:[%s1737_s8 + $0x8] sm:$0xff]  ;;  %v1256_v49 = vld [vmem:[%s1737_s8 + $0x18] sm:$0xff]  ;;  %vm446_vm15 = vcmp.ne.s32.totalorder %v1211_v36, 4294967294  ;;  %vm447_vm0 = vcmp.ne.s32.totalorder %v1206_v35, 4294967294 }
   0x9   :  { %983 = vmatprep.subr.bf16.mxu0 %v982_v12  ;;  %v420_v34 = vand.u32 3, %v415_v33  ;;  %v1233_v40 = vld [vmem:[%s1735_s6] ss:$0 sm:$0xff]  ;;  %v1247_v45 = vld [vmem:[%s1736_s7 + $0x28] sm:$0xff]  ;;  %vm755_vm5 = vcmp.ne.f32.partialorder %v749_v43, 0.0  ;;  %vm757_vm9 = vcmp.ne.f32.partialorder %v1256_v49, 0.0 }
   0xa   :  { %950 = vmatmul.mubr.msk.f32.gmra.mrb[2].mxu1 %vm57_vm1, %v48_v9  ;;  %985 = vmatpush3.bf16.msra.mxu0 %v982_v12  ;;  %1747 = vst [vmem:[#allocation8_spill] sm:$0xff] %v1247_v45  ;;  %v748_v48 = vld [vmem:[%s1737_s8] sm:$0xff]  ;;  %v1272_v55 = vld [vmem:[%s1737_s8 + $0x10] sm:$0xff]  ;;  %v1292_v61 = vsel %vm755_vm5, 1.0, %v1740_v41  ;;  %v1301_v4 = vsel %vm757_vm9, 1.0, %v1740_v41  ;;  %vm723_vm1 = vcmask 97280  }
   0xb   :  { %vm429_vm3 = vcmp.eq.s32.totalorder %v1206_v35, %v420_v34  ;;  %vm428_vm4 = vcmp.eq.s32.totalorder %v1211_v36, %v420_v34  ;;  %vm431_vm6 = vcmp.eq.s32.totalorder %v1218_v37, %v420_v34  ;;  %vm430_vm7 = vcmp.eq.s32.totalorder %v1223_v38, %v420_v34  ;;  %v1262_v50 = vld [vmem:[%s1736_s7 + $0x20] sm:$0xff] }
   0xc   :  { %v1236_v42 = vsel %vm429_vm3, 1.0, %v1740_v41  ;;  %v1242_v44 = vsel %vm428_vm4, 1.0, %v1740_v41  ;;  %vm754_vm8 = vcmp.ne.f32.partialorder %v748_v48, 0.0  ;;  %vm756_vm10 = vcmp.ne.f32.partialorder %v1272_v55, 0.0  ;;  %v1319_v12 = vld [vmem:[%s1737_s8 + $0x20] sm:$0xff] }
   0xd   :  { %vm433_vm11 = vcmp.eq.s32.totalorder %v1247_v45, %v420_v34  ;;  %v1284_v59 = vsel %vm431_vm6, 1.0, %v1740_v41  ;;  %v1287_v60 = vsel %vm430_vm7, 1.0, %v1740_v41  ;;  %vm432_vm12 = vcmp.eq.s32.totalorder %v1262_v50, %v420_v34 }
   0xe   :  { %v1296_v0 = vsel %vm754_vm8, 1.0, %v1740_v41  ;;  %v1306_v7 = vsel %vm756_vm10, 1.0, %v1740_v41  ;;  %v1311_v8 = vsel %vm433_vm11, 1.0, %v1740_v41  ;;  %vm758_vm13 = vcmp.ne.f32.partialorder %v1319_v12, 0.0 }
   0xf   :  { %v1743_v32 = vsub.f32 1.0, %v1284_v59  ;;  %v1353_v33 = vsel %vm758_vm13, 1.0, %v1740_v41  ;;  %v1370_v35 = vsel %vm446_vm15, 1.0, %v1740_v41 }
  0xd7   :  { %v945_v14 = vpop.f32.mrb[0].mxu0 }
  0xd8   :  { %v152_v15 = vadd.f32 %v945_v14, %v878_v13  ;;  %v146_v16 = vpop.f32.mrb[1].mxu0 }
  0xd9   :  { %v147_v17 = vadd.f32 %v878_v13, %v146_v16  ;;  %v948_v18 = vpop.f32.mrb[0].mxu1 }
  0xda   :  { %v156_v19 = vpop.f32.mrb[1].mxu1  ;;  %v176_v22 = vmax.f32 %v152_v15, 0.0  ;;  %v162_v23 = vadd.f32 %v948_v18, %v878_v13  ;;  %v1745_v15 = vsub.f32 1.0, %v1236_v42 }
  0xdb   :  { %v175_v20 = vmax.f32 %v147_v17, 0.0  ;;  %v157_v21 = vadd.f32 %v878_v13, %v156_v19 }
  0xdc   :  { %v178_v28 = vmax.f32 %v162_v23, 0.0  ;;  %v1744_v23 = vsub.f32 1.0, %v1242_v44 }
  0xdd   :  { %v177_v24 = vmax.f32 %v157_v21, 0.0  ;;  %956 = vmatprep.mubr.msk.f32.mxu1 %vm190_vm2, %v175_v20  ;;  %969 = vmatprep.mubr.msk.f32.mxu0 %vm190_vm2, %v175_v20  ;;  %v951_v25 = vpop.f32.mrb[2].mxu1  ;;  %v1336_v21 = vld [vmem:[%s1737_s8 + $0x28] sm:$0xff]  ;;  %s1092_s8 = smov [#allocation2]  }
  0xde   :  { %957 = vmatmul.mubr.msk.f32.vlgmr.msra.gmra.mrb[4].mxu1 %vm190_vm2, %v176_v22  ;;  %970 = vmatmul.mubr.msk.f32.vlgmr.msra.gmra.mrb[2].mxu0 %vm190_vm2, %v176_v22  ;;  %v166_v26 = vpop.f32.mrb[3].mxu1  ;;  %v172_v29 = vadd.f32 %v951_v25, %v878_v13  ;;  %v549_v22 = vmul.f32 0.25, %v1236_v42  ;;  %vm759_vm14 = vcmp.ne.f32.partialorder %v1336_v21, 0.0  ;;  %s856_s0 = sshll.u32 %s1092_s8, 4  ;;  %s857_s0 = int_to_ptr.vmem [resolvable:$true] %s856_s0 }
  0xdf   :  { %v167_v27 = vadd.f32 %v878_v13, %v166_v26  ;;  %959 = vmatprep.mubr.msk.f32.mxu1 %vm190_vm2, %v177_v24  ;;  %972 = vmatprep.mubr.msk.f32.mxu0 %vm190_vm2, %v177_v24  ;;  %v1324_v13 = vsel %vm432_vm12, 1.0, %v1740_v41  ;;  %v555_v26 = vmul.f32 0.75, %v1745_v15  ;;  %v1367_v36 = vsel %vm759_vm14, 1.0, %v1740_v41  ;;  %s1043_s17 = scalar_lea.vmem %s857_s0, 16  ;;  %s1047_s18 = scalar_lea.vmem %s857_s0, 32 }
  0xe0   :  { %v180_v31 = vmax.f32 %v172_v29, 0.0  ;;  %p1044_p0 = scmp.ne.s32.totalorder %s857_s0, %s1043_s17  ;;  %p1048_p1 = scmp.lt.s32.totalorder %s857_s0, %s857_s0 }
  0xe1   :  { %v179_v30 = vmax.f32 %v167_v27, 0.0  ;;  %p1049_p2 = scmp.lt.s32.totalorder %s1047_s18, %s1043_s17 }
  0xe2   :  { %960 = vmatmul.mubr.msk.f32.gmra.mrb[6].mxu1 %vm190_vm2, %v178_v28  ;;  %973 = vmatmul.mubr.msk.f32.gmra.mrb[4].mxu0 %vm190_vm2, %v178_v28 }
  0xe3   :  { %962 = vmatprep.mubr.msk.f32.mxu1 %vm190_vm2, %v179_v30  ;;  %975 = vmatprep.mubr.msk.f32.mxu0 %vm190_vm2, %v179_v30  ;;  %p1050_p3 = por %p1049_p2, %p1048_p1 }
  0xe5   :  { %p1051_p4 = pnand %p1050_p3, %p1044_p0 }
  0xe6   :  { %963 = vmatmul.mubr.msk.f32.gmra.mrb[8].mxu1 %vm190_vm2, %v180_v31  ;;  %976 = vmatmul.mubr.msk.f32.gmra.mrb[6].mxu0 %vm190_vm2, %v180_v31 }
 0x1b1   :  { %v958_v46 = vpop.f32.mrb[4].mxu1  ;;  %v971_v47 = vpop.f32.mrb[2].mxu0 }
 0x1b2   :  { %v1265_v51 = vadd.f32 %v958_v46, %v1228_v39  ;;  %v385_v52 = vadd.f32 %v971_v47, %v1233_v40  ;;  %v275_v53 = vpop.f32.mrb[5].mxu1  ;;  %v379_v54 = vpop.f32.mrb[3].mxu0  ;;  %v548_v47 = vmul.f32 0.25, %v1242_v44 }
 0x1b3   :  { %v1275_v56 = vadd.f32 %v1228_v39, %v275_v53  ;;  %v380_v57 = vadd.f32 %v1233_v40, %v379_v54  ;;  %v550_v53 = vmul.f32 0.25, %v1287_v60 }
 0x1b4   :  { %v465_v58 = vand.u32 2147483647, %v1265_v51  ;;  %v773_v62 = vsub.f32 %v385_v52, %v749_v43  ;;  %v1742_v52 = vsub.f32 1.0, %v1287_v60  ;;  %vm501_vm2 = vcmp.ge.f32.partialorder %v1265_v51, 0.0 }
 0x1b5   :  { %v464_v63 = vand.u32 2147483647, %v1275_v56  ;;  %v961_v1 = vpop.f32.mrb[6].mxu1  ;;  %v974_v2 = vpop.f32.mrb[4].mxu0  ;;  %v772_v10 = vsub.f32 %v380_v57, %v748_v48  ;;  %v554_v48 = vmul.f32 0.75, %v1744_v23  ;;  %vm500_vm3 = vcmp.ge.f32.partialorder %v1275_v56, 0.0 }
 0x1b6   :  { %v471_v3 = vsub.f32 0.0, %v465_v58  ;;  %v285_v5 = vpop.f32.mrb[7].mxu1  ;;  %v389_v6 = vpop.f32.mrb[5].mxu0  ;;  %v1314_v11 = vadd.f32 %v961_v1, %v1228_v39  ;;  %v779_v16 = vand.u32 2147483647, %v773_v62  ;;  %v395_v19 = vadd.f32 %v974_v2, %v1233_v40 }
 0x1b7   :  { %v470_v9 = vsub.f32 0.0, %v464_v63  ;;  %v1331_v20 = vadd.f32 %v1228_v39, %v285_v5  ;;  %v778_v27 = vand.u32 2147483647, %v772_v10  ;;  %v1373_v62 = vsel %vm447_vm0, 1.0, %v1740_v41 }
 0x1b8   :  { %v478_v14 = vmul.f32 1.442695, %v471_v3  ;;  %v467_v18 = vand.u32 2147483647, %v1314_v11  ;;  %v785_v31 = vmin.f32 %v779_v16, 0.1  ;;  %v775_v43 = vsub.f32 %v395_v19, %v1256_v49 }
 0x1b9   :  { %v476_v17 = vmul.f32 1.442695, %v470_v9  ;;  %v964_v24 = vpop.f32.mrb[8].mxu1  ;;  %v1340_v25 = vpop.f32.mrb[6].mxu0  ;;  %v466_v46 = vand.u32 2147483647, %v1331_v20  ;;  %v390_v2 = vadd.f32 %v1233_v40, %v389_v6  ;;  %v633_v41 = vmul.f32 %v1236_v42, %v1265_v51 }
 0x1ba   :  { %995 = vpow2.f32 %v478_v14  ;;  %v473_v28 = vsub.f32 0.0, %v467_v18  ;;  %v1345_v29 = vpop.f32.mrb[9].mxu1  ;;  %v1347_v30 = vpop.f32.mrb[7].mxu0  ;;  %v784_v54 = vmin.f32 %v778_v27, 0.1  ;;  %v791_v49 = vsub.f32 %v779_v16, %v785_v31 }
 0x1bb   :  { %997 = vpow2.f32 %v476_v17  ;;  %v472_v57 = vsub.f32 0.0, %v466_v46  ;;  %v798_v58 = vmul.f32 0.5, %v785_v31  ;;  %v781_v63 = vand.u32 2147483647, %v775_v43 }
 0x1bc   :  { %v482_v34 = vmul.f32 1.442695, %v473_v28  ;;  %v1378_v5 = vadd.f32 %v964_v24, %v1228_v39  ;;  %v551_v10 = vmul.f32 0.25, %v1284_v59  ;;  %v556_v14 = vmul.f32 0.75, %v1742_v52 }
 0x1bd   :  { %v480_v1 = vmul.f32 1.442695, %v472_v57  ;;  %v790_v16 = vsub.f32 %v778_v27, %v784_v54  ;;  %v797_v17 = vmul.f32 0.5, %v784_v54  ;;  %v557_v18 = vmul.f32 0.75, %v1743_v32 }
 0x1be   :  { %999 = vpow2.f32 %v482_v34  ;;  %v804_v6 = vmul.f32 %v798_v58, %v785_v31  ;;  %v810_v28 = vmul.f32 0.1, %v791_v49  ;;  %v1388_v34 = vadd.f32 %v554_v48, %v548_v47 }
 0x1bf   :  { %1001 = vpow2.f32 %v480_v1  ;;  %v1390_v24 = vadd.f32 %v555_v26, %v549_v22  ;;  %v627_v57 = vmax.f32 %v1265_v51, 0.0  ;;  %v787_v27 = vmin.f32 %v781_v63, 0.1 }
 0x1c0   :  { %v774_v1 = vsub.f32 %v390_v2, %v1272_v55  ;;  %v626_v47 = vmax.f32 %v1275_v56, 0.0  ;;  %v469_v22 = vand.u32 2147483647, %v1378_v5  ;;  %v632_v26 = vmul.f32 %v1242_v44, %v1275_v56 }
 0x1c1   :  { %v803_v48 = vmul.f32 %v797_v17, %v784_v54  ;;  %v809_v49 = vmul.f32 0.1, %v790_v16  ;;  %v816_v58 = vadd.f32 %v810_v28, %v804_v6  ;;  %v629_v3 = vmax.f32 %v1314_v11, 0.0 }
 0x1c2   :  { %v635_v55 = vmul.f32 %v1284_v59, %v1314_v11  ;;  %v1407_v2 = vadd.f32 %v556_v14, %v550_v53  ;;  %v793_v52 = vsub.f32 %v781_v63, %v787_v27  ;;  %v800_v32 = vmul.f32 0.5, %v787_v27 }
 0x1c3   :  { %v780_v23 = vand.u32 2147483647, %v774_v1  ;;  %v1411_v15 = vsub.f32 %v627_v57, %v633_v41  ;;  %v475_v54 = vsub.f32 0.0, %v469_v22  ;;  %v1416_v16 = vadd.f32 %v557_v18, %v551_v10 }
 0x1c4   :  { %v1386_v19 = vpop.eup %995  ;;  %v1419_v17 = vsub.f32 %v626_v47, %v632_v26  ;;  %v815_v53 = vadd.f32 %v809_v49, %v803_v48  ;;  %v628_v14 = vmax.f32 %v1331_v20, 0.0  ;;  %v634_v63 = vmul.f32 %v1287_v60, %v1331_v20 }
 0x1c5   :  { %v1392_v43 = vpop.eup %997  ;;  %v489_v46 = vadd.f32 1.0, %v1386_v19  ;;  %v822_v6 = vmul.f32 %v1292_v61, %v816_v58  ;;  %v486_v41 = vmul.f32 1.442695, %v475_v54  ;;  %v1428_v28 = vadd.f32 %v1228_v39, %v1345_v29 }
 0x1c6   :  { %v488_v31 = vadd.f32 1.0, %v1392_v43  ;;  %v1433_v18 = vsub.f32 %v629_v3, %v635_v55  ;;  %v806_v57 = vmul.f32 %v800_v32, %v787_v27  ;;  %v812_v1 = vmul.f32 0.1, %v793_v52 }
 0x1c7   :  { %1003 = vrcp.f32 %v489_v46  ;;  %v786_v47 = vmin.f32 %v780_v23, 0.1  ;;  %v405_v61 = vadd.f32 %v1340_v25, %v1233_v40  ;;  %v400_v26 = vadd.f32 %v1233_v40, %v1347_v30 }
 0x1c8   :  { %v1409_v9 = vpop.eup %999  ;;  %1005 = vrcp.f32 %v488_v31  ;;  %v656_v39 = vmul.f32 -0.5, %v1386_v19  ;;  %v821_v29 = vmul.f32 %v1296_v0, %v815_v53  ;;  %v468_v3 = vand.u32 2147483647, %v1428_v28 }
 0x1c9   :  { %v1414_v45 = vadd.f32 1.0, %v1409_v9  ;;  %v1430_v10 = vpop.eup %1001  ;;  %v1444_v32 = vsel %vm723_vm1, %v822_v6, 0.0  ;;  %v647_v52 = vmul.f32 -0.5, %v1392_v43  ;;  %v1447_v27 = vsub.f32 %v628_v14, %v634_v63 }
 0x1ca   :  { %v490_v22 = vadd.f32 1.0, %v1430_v10  ;;  %vm503_vm4 = vcmp.ge.f32.partialorder %v1314_v11, 0.0  ;;  %v818_v40 = vadd.f32 %v812_v1, %v806_v57  ;;  %v799_v25 = vmul.f32 0.5, %v786_v47 }
 0x1cb   :  { %1007 = vrcp.f32 %v1414_v45  ;;  %v474_v30 = vsub.f32 0.0, %v468_v3  ;;  %v659_v0 = vand.u32 2147483647, %v1386_v19  ;;  %v792_v49 = vsub.f32 %v780_v23, %v786_v47 }
 0x1cc   :  { %1009 = vpow2.f32 %v486_v41  ;;  %v776_v58 = vsub.f32 %v400_v26, %v1319_v12  ;;  %v657_v54 = vadd.f32 1.0, %v656_v39  ;;  %v650_v53 = vand.u32 2147483647, %v1392_v43 }
 0x1cd   :  { %1011 = vlog2.f32 %v489_v46  ;;  %v1455_v14 = vsel %vm723_vm1, %v821_v29, 0.0  ;;  %v648_v41 = vadd.f32 1.0, %v647_v52  ;;  %v777_v57 = vsub.f32 %v405_v61, %v1336_v21 }
 0x1ce   :  { %1013 = vrcp.f32 %v490_v22  ;;  %v1462_v23 = vmul.f32 %v1301_v4, %v818_v40  ;;  %vm502_vm5 = vcmp.ge.f32.partialorder %v1331_v20, 0.0  ;;  %v805_v12 = vmul.f32 %v799_v25, %v786_v47 }
 0x1cf   :  { %1015 = vlog2.f32 %v488_v31  ;;  %v484_v31 = vmul.f32 1.442695, %v474_v30  ;;  %v811_v29 = vmul.f32 0.1, %v792_v49  ;;  %v782_v51 = vand.u32 2147483647, %v776_v58 }
 0x1d0   :  { %1017 = vlog2.f32 %v490_v22  ;;  %v1748_v52 = vsub.f32 1.0, %v1236_v42  ;;  %v1471_v61 = vmul.f32 %v1386_v19, %v657_v54  ;;  %vm1473_vm6 = vcmp.lt.f32.partialorder %v659_v0, 0.0004427343 }
 0x1d1   :  { %v1004_v48 = vpop.eup %1003  ;;  %1019 = vpow2.f32 %v484_v31  ;;  %v1480_v56 = vmul.f32 %v1392_v43, %v648_v41  ;;  %v783_v40 = vand.u32 2147483647, %v777_v57  ;;  %v1751_v30 = vsub.f32 1.0, %v1242_v44 }
 0x1d2   :  { %v507_v46 = vmul.f32 %v1004_v48, %v1386_v19  ;;  %v1006_v55 = vpop.eup %1005  ;;  %1021 = vlog2.f32 %v1414_v45  ;;  %vm1487_vm7 = vcmp.lt.f32.partialorder %v650_v53, 0.0004427343  ;;  %v665_v45 = vmul.f32 -0.5, %v1430_v10 }
 0x1d3   :  { %v506_v6 = vmul.f32 %v1006_v55, %v1392_v43  ;;  %v788_v54 = vmin.f32 %v782_v51, 0.1  ;;  %v668_v53 = vand.u32 2147483647, %v1430_v10  ;;  %vm505_vm8 = vcmp.ge.f32.partialorder %v1378_v5, 0.0 }
 0x1d4   :  { %v513_v63 = vsel %vm501_vm2, %v1004_v48, %v507_v46  ;;  %vm504_vm10 = vcmp.ge.f32.partialorder %v1428_v28, 0.0 }
 0x1d5   :  { %v531_v1 = vsub.f32 1.0, %v513_v63  ;;  %v1008_v26 = vpop.eup %1007  ;;  %v512_v39 = vsel %vm500_vm3, %v1006_v55, %v506_v6  ;;  %v519_v3 = vmul.f32 %v1236_v42, %v513_v63  ;;  %v817_v55 = vadd.f32 %v811_v29, %v805_v12 }
 0x1d6   :  { %v530_v47 = vsub.f32 1.0, %v512_v39  ;;  %v1477_v22 = vpop.eup %1009  ;;  %v509_v48 = vmul.f32 %v1008_v26, %v1409_v9  ;;  %v518_v19 = vmul.f32 %v1242_v44, %v512_v39  ;;  %v1754_v12 = vsub.f32 1.0, %v1284_v59 }
 0x1d7   :  { %v537_v21 = vmul.f32 %v531_v1, %v1748_v52  ;;  %v1012_v42 = vpop.eup %1011  ;;  %v1492_v49 = vadd.f32 1.0, %v1477_v22  ;;  %v1500_v1 = vmin.f32 %v783_v40, 0.1  ;;  %vm1535_vm9 = vcmp.lt.f32.partialorder %v668_v53, 0.0004427343 }
 0x1d8   :  { %v536_v46 = vmul.f32 %v530_v47, %v1751_v30  ;;  %v1014_v43 = vpop.eup %1013  ;;  %v515_v58 = vsel %vm503_vm4, %v1008_v26, %v509_v48  ;;  %v655_v41 = vmul.f32 0.6931472, %v1012_v42  ;;  %v801_v47 = vmul.f32 0.5, %v788_v54 }
 0x1d9   :  { %v543_v25 = vadd.f32 %v537_v21, %v519_v3  ;;  %v1016_v31 = vpop.eup %1015  ;;  %v533_v44 = vsub.f32 1.0, %v515_v58  ;;  %v508_v57 = vmul.f32 %v1014_v43, %v1430_v10  ;;  %1023 = vrcp.f32 %v1492_v49 }
 0x1da   :  { %v542_v6 = vadd.f32 %v536_v46, %v518_v19  ;;  %v521_v26 = vmul.f32 %v1284_v59, %v515_v58  ;;  %v646_v3 = vmul.f32 0.6931472, %v1016_v31  ;;  %v794_v21 = vsub.f32 %v782_v51, %v788_v54  ;;  %v1018_v48 = vpop.eup %1017 }
 0x1db   :  { %v567_v63 = vsub.f32 1.0, %v543_v25  ;;  %v539_v29 = vmul.f32 %v533_v44, %v1754_v12  ;;  %v514_v52 = vsel %vm502_vm5, %v1014_v43, %v508_v57  ;;  %v666_v30 = vadd.f32 1.0, %v665_v45  ;;  %v1511_v46 = vpop.eup %1019 }
 0x1dc   :  { %v566_v11 = vsub.f32 1.0, %v542_v6  ;;  %v532_v19 = vsub.f32 1.0, %v514_v52  ;;  %v661_v58 = vsel %vm1473_vm6, %v1471_v61, %v655_v41  ;;  %v520_v59 = vmul.f32 %v1287_v60, %v514_v52 }
 0x1dd   :  { %v1502_v39 = vmax.f32 %v567_v63, 0.0  ;;  %v545_v25 = vadd.f32 %v539_v29, %v521_v26  ;;  %v795_v20 = vsub.f32 %v783_v40, %v1500_v1  ;;  %v1755_v43 = vsub.f32 1.0, %v1287_v60  ;;  %v1022_v63 = vpop.eup %1021 }
 0x1de   :  { %v1509_v42 = vmax.f32 %v566_v11, 0.0  ;;  %v492_v45 = vadd.f32 1.0, %v1511_v46  ;;  %v652_v61 = vsel %vm1487_vm7, %v1480_v56, %v646_v3  ;;  %v807_v4 = vmul.f32 %v801_v47, %v788_v54 }
 0x1df   :  { %1025 = vrsqrt.f32 %v1502_v39  ;;  %v569_v51 = vsub.f32 1.0, %v545_v25  ;;  %v538_v31 = vmul.f32 %v532_v19, %v1755_v43  ;;  %v813_v6 = vmul.f32 0.1, %v794_v21 }
 0x1e0   :  { %1027 = vrsqrt.f32 %v1509_v42  ;;  %v674_v44 = vmul.f32 -0.5, %v1409_v9  ;;  %v1530_v57 = vmul.f32 0.6931472, %v1018_v48  ;;  %v1533_v60 = vmul.f32 %v1430_v10, %v666_v30 }
 0x1e1   :  { %v1528_v40 = vmax.f32 %v569_v51, 0.0  ;;  %v544_v41 = vadd.f32 %v538_v31, %v520_v59  ;;  %1029 = vrcp.f32 %v492_v45  ;;  %v823_v0 = vmul.f32 %v1306_v7, %v817_v55 }
 0x1e2   :  { %v802_v56 = vmul.f32 0.5, %v1500_v1  ;;  %v1542_v54 = vadd.f32 %v661_v58, %v1411_v15  ;;  %v814_v12 = vmul.f32 0.1, %v795_v20  ;;  %v1546_v3 = vadd.f32 %v652_v61, %v1419_v17 }
 0x1e3   :  { %v568_v26 = vsub.f32 1.0, %v544_v41  ;;  %1031 = vrsqrt.f32 %v1528_v40  ;;  %v1024_v29 = vpop.eup %1023  ;;  %v1548_v10 = vmul.f32 0.6931472, %v1022_v63  ;;  %v675_v53 = vadd.f32 1.0, %v674_v44 }
 0x1e4   :  { %v677_v52 = vand.u32 2147483647, %v1409_v9  ;;  %v670_v7 = vsel %vm1535_vm9, %v1533_v60, %v1530_v57  ;;  %v511_v15 = vmul.f32 %v1024_v29, %v1477_v22  ;;  %v819_v55 = vadd.f32 %v813_v6, %v807_v4 }
 0x1e5   :  { %v1551_v21 = vmax.f32 %v568_v26, 0.0  ;;  %vm580_vm11 = vcmp.eq.f32.partialorder %v1509_v42, inf  ;;  %vm587_vm12 = vcmp.eq.f32.partialorder %v1502_v39, inf  ;;  %vm589_vm13 = vcmp.eq.f32.partialorder %v1502_v39, 0.0 }
 0x1e6   :  { %1033 = vlog2.f32 %v1492_v49  ;;  %v517_v17 = vsel %vm505_vm8, %v1024_v29, %v511_v15  ;;  %vm582_vm14 = vcmp.eq.f32.partialorder %v1509_v42, 0.0  ;;  %v583_v47 = vand.u32 2147483648, %v1509_v42 }
 0x1e7   :  { %1035 = vrsqrt.f32 %v1551_v21  ;;  %v535_v25 = vsub.f32 1.0, %v517_v17  ;;  %v590_v19 = vand.u32 2147483648, %v1502_v39  ;;  %v1570_v30 = vmul.f32 %v1409_v9, %v675_v53 }
 0x1e8   :  { %vm1572_vm15 = vcmp.lt.f32.partialorder %v677_v52, 0.0004427343  ;;  %vm601_vm0 = vcmp.eq.f32.partialorder %v1528_v40, inf  ;;  %1037 = vlog2.f32 %v492_v45  ;;  %v808_v20 = vmul.f32 %v802_v56, %v1500_v1 }
 0x1e9   :  { %v1026_v48 = vpop.eup %1025  ;;  %v523_v51 = vmul.f32 %v1311_v8, %v517_v17  ;;  %v1760_v43 = vsub.f32 1.0, %v1311_v8  ;;  %v829_v63 = vadd.f32 %v1444_v32, %v1455_v14  ;;  %vm603_vm2 = vcmp.eq.f32.partialorder %v1528_v40, 0.0 }
 0x1ea   :  { %v1028_v49 = vpop.eup %1027  ;;  %v586_v59 = vmul.f32 %v1026_v48, %v1502_v39  ;;  %v604_v45 = vand.u32 2147483648, %v1528_v40  ;;  %v679_v1 = vsel %vm1572_vm15, %v1570_v30, %v1548_v10  ;;  %v820_v29 = vadd.f32 %v814_v12, %v808_v20 }
 0x1eb   :  { %v541_v31 = vmul.f32 %v535_v25, %v1760_v43  ;;  %v579_v9 = vmul.f32 %v1028_v49, %v1509_v42  ;;  %v1030_v61 = vpop.eup %1029  ;;  %v830_v53 = vsel %vm723_vm1, %v823_v0, 0.0  ;;  %vm448_vm3 = vcmp.ne.s32.totalorder %v1223_v38, 4294967294 }
 0x1ec   :  { %v588_v4 = vsel %vm587_vm12, %v1502_v39, %v586_v59  ;;  %v510_v6 = vmul.f32 %v1030_v61, %v1511_v46  ;;  %vm449_vm4 = vcmp.ne.s32.totalorder %v1218_v37, 4294967294  ;;  %vm594_vm5 = vcmp.eq.f32.partialorder %v1551_v21, inf }
 0x1ed   :  { %v547_v44 = vadd.f32 %v541_v31, %v523_v51  ;;  %v581_v32 = vsel %vm580_vm11, %v1509_v42, %v579_v9  ;;  %v591_v14 = vsel %vm589_vm13, %v590_v19, %v588_v4  ;;  %v1032_v41 = vpop.eup %1031  ;;  %vm596_vm6 = vcmp.eq.f32.partialorder %v1551_v21, 0.0 }
 0x1ee   :  { %v584_v56 = vsel %vm582_vm14, %v583_v47, %v581_v32  ;;  %v621_v26 = vmul.f32 %v591_v14, %v1502_v39  ;;  %v516_v10 = vsel %vm504_vm10, %v1030_v61, %v510_v6  ;;  %v600_v15 = vmul.f32 %v1032_v41, %v1528_v40 }
 0x1ef   :  { %v571_v52 = vsub.f32 1.0, %v547_v44  ;;  %v620_v17 = vmul.f32 %v584_v56, %v1509_v42  ;;  %v534_v48 = vsub.f32 1.0, %v516_v10  ;;  %v825_v39 = vmul.f32 %v1353_v33, %v819_v55 }
 0x1f0   :  { %v1613_v0 = vpop.eup %1033  ;;  %v522_v12 = vmul.f32 %v1324_v13, %v516_v10  ;;  %v602_v25 = vsel %vm601_vm0, %v1528_v40, %v600_v15  ;;  %v1761_v30 = vsub.f32 1.0, %v1324_v13  ;;  %v706_v33 = vmul.f32 %v621_v26, %v1390_v24 }
 0x1f1   :  { %v1616_v47 = vmax.f32 %v571_v52, 0.0  ;;  %v705_v19 = vmul.f32 %v620_v17, %v1388_v34  ;;  %v1036_v42 = vpop.eup %1035  ;;  %v605_v49 = vsel %vm603_vm2, %v604_v45, %v602_v25  ;;  %v831_v55 = vadd.f32 %v830_v53, %v829_v63 }
 0x1f2   :  { %v540_v58 = vmul.f32 %v534_v48, %v1761_v30  ;;  %v593_v59 = vmul.f32 %v1036_v42, %v1551_v21  ;;  %v597_v20 = vand.u32 2147483648, %v1551_v21  ;;  %v826_v51 = vmul.f32 %v1367_v36, %v820_v29  ;;  %v1038_v43 = vpop.eup %1037 }
 0x1f3   :  { %1039 = vrsqrt.f32 %v1616_v47  ;;  %v623_v31 = vmul.f32 %v605_v49, %v1528_v40  ;;  %v711_v9 = vmul.f32 %v705_v19, %v1546_v3  ;;  %v832_v61 = vsel %vm723_vm1, %v1462_v23, 0.0 }
 0x1f4   :  { %v546_v34 = vadd.f32 %v540_v58, %v522_v12  ;;  %v595_v24 = vsel %vm594_vm5, %v1551_v21, %v593_v59  ;;  %v712_v63 = vmul.f32 %v706_v33, %v1542_v54  ;;  %v833_v4 = vadd.f32 %v832_v61, %v831_v55 }
 0x1f5   :  { %v834_v45 = vsel %vm723_vm1, %v825_v39, 0.0  ;;  %v598_v36 = vsel %vm596_vm6, %v597_v20, %v595_v24  ;;  %v708_v40 = vmul.f32 %v623_v31, %v1416_v16  ;;  %v717_v3 = vmul.f32 %v1370_v35, %v711_v9 }
 0x1f6   :  { %v570_v6 = vsub.f32 1.0, %v546_v34  ;;  %v622_v44 = vmul.f32 %v598_v36, %v1551_v21  ;;  %v701_v23 = vadd.f32 %v679_v1, %v1433_v18  ;;  %v718_v32 = vmul.f32 %v1373_v62, %v712_v63 }
 0x1f7   :  { %v835_v14 = vadd.f32 %v834_v45, %v833_v4  ;;  %v700_v54 = vadd.f32 %v670_v7, %v1447_v27  ;;  %v724_v56 = vsel %vm723_vm1, %v717_v3, 0.0  ;;  %v836_v16 = vsel %vm723_vm1, %v826_v51, 0.0 }
 0x1f8   :  { %v576_v41 = vmax.f32 %v570_v6, 0.0  ;;  %v707_v35 = vmul.f32 %v622_v44, %v1407_v2  ;;  %v714_v21 = vmul.f32 %v708_v40, %v701_v23  ;;  %v725_v18 = vsel %vm723_vm1, %v718_v32, 0.0 }
 0x1f9   :  { %v1657_v1 = vadd.f32 %v836_v16, %v835_v14  ;;  %v1762_v62 = vmov 0.0   ;;  %v726_v60 = vadd.f32 %v725_v18, %v724_v56  ;;  %v692_v7 = vmul.f32 -0.5, %v1477_v22 }
 0x1fa   :  { %v908_v11 = vsel %vm448_vm3, 1.0, %v1762_v62  ;;  %v909_v27 = vsel %vm449_vm4, 1.0, %v1762_v62  ;;  %1041 = vrsqrt.f32 %v576_v41  ;;  %v713_v57 = vmul.f32 %v707_v35, %v700_v54 }
 0x1fb   :  { %v552_v2 = vmul.f32 0.25, %v1324_v13  ;;  %v553_v29 = vmul.f32 0.25, %v1311_v8  ;;  %v720_v10 = vmul.f32 %v909_v27, %v714_v21  ;;  %v1763_v52 = vmov %v1761_v30 }
 0x1fc   :  { %v719_v53 = vmul.f32 %v908_v11, %v713_v57  ;;  %v558_v38 = vmul.f32 0.75, %v1763_v52  ;;  %v1764_v15 = vsub.f32 1.0, %v1311_v8  ;;  %v683_v48 = vmul.f32 -0.5, %v1511_v46 }
 0x1fd   :  { %v1040_v26 = vpop.eup %1039  ;;  %v631_v39 = vmax.f32 %v1378_v5, 0.0  ;;  %vm615_vm7 = vcmp.eq.f32.partialorder %v1616_v47, inf  ;;  %v618_v12 = vand.u32 2147483648, %v1616_v47  ;;  %vm617_vm8 = vcmp.eq.f32.partialorder %v1616_v47, 0.0 }
 0x1fe   :  { %v559_v17 = vmul.f32 0.75, %v1764_v15  ;;  %v614_v37 = vmul.f32 %v1040_v26, %v1616_v47  ;;  %v727_v25 = vsel %vm723_vm1, %v719_v53, 0.0  ;;  %v693_v42 = vadd.f32 1.0, %v692_v7 }
 0x1ff   :  { %v728_v30 = vadd.f32 %v727_v25, %v726_v60  ;;  %v637_v49 = vmul.f32 %v1311_v8, %v1378_v5  ;;  %v695_v33 = vand.u32 2147483647, %v1477_v22  ;;  %v729_v55 = vsel %vm723_vm1, %v720_v10, 0.0 }
 0x200   :  { %v616_v19 = vsel %vm615_vm7, %v1616_v47, %v614_v37  ;;  %v684_v59 = vadd.f32 1.0, %v683_v48  ;;  %v691_v20 = vmul.f32 0.6931472, %v1613_v0  ;;  %v565_v34 = vadd.f32 %v559_v17, %v553_v29 }
 0x201   :  { %v619_v58 = vsel %vm617_vm8, %v618_v12, %v616_v19  ;;  %v730_v51 = vadd.f32 %v729_v55, %v728_v30  ;;  %v686_v9 = vand.u32 2147483647, %v1511_v46  ;;  %v630_v24 = vmax.f32 %v1428_v28, 0.0 }
 0x202   :  { %v625_v31 = vmul.f32 %v619_v58, %v1616_v47  ;;  %v564_v63 = vadd.f32 %v558_v38, %v552_v2  ;;  %v682_v4 = vmul.f32 0.6931472, %v1038_v43  ;;  %v694_v8 = vmul.f32 %v1477_v22, %v693_v42  ;;  %v1765_v22 = vld [vmem:[#allocation8_spill] sm:$0xff] }
 0x203   :  { %v636_v45 = vmul.f32 %v1324_v13, %v1428_v28  ;;  %v643_v6 = vsub.f32 %v631_v39, %v637_v49  ;;  %vm696_vm9 = vcmp.lt.f32.partialorder %v695_v33, 0.0004427343  ;;  %vm608_vm10 = vcmp.eq.f32.partialorder %v576_v41, inf }
 0x204   :  { %v1042_v61 = vpop.eup %1041  ;;  %v611_v0 = vand.u32 2147483648, %v576_v41  ;;  %v685_v36 = vmul.f32 %v1511_v46, %v684_v59  ;;  %v697_v47 = vsel %vm696_vm9, %v694_v8, %v691_v20  ;;  %vm610_vm11 = vcmp.eq.f32.partialorder %v576_v41, 0.0 }
 0x205   :  { %v607_v5 = vmul.f32 %v1042_v61, %v576_v41  ;;  %vm687_vm12 = vcmp.lt.f32.partialorder %v686_v9, 0.0004427343  ;;  %v710_v3 = vmul.f32 %v625_v31, %v565_v34  ;;  %vm450_vm13 = vcmp.ne.s32.totalorder %v1262_v50, 4294967294 }
 0x206   :  { %v688_v44 = vsel %vm687_vm12, %v685_v36, %v682_v4  ;;  %vm451_vm14 = vcmp.ne.s32.totalorder %v1765_v22, 4294967294  ;;  %v642_v32 = vsub.f32 %v630_v24, %v636_v45  ;;  %v703_v13 = vadd.f32 %v697_v47, %v643_v6 }
 0x207   :  { %v609_v40 = vsel %vm608_vm10, %v576_v41, %v607_v5  ;;  %v910_v56 = vsel %vm450_vm13, 1.0, %v1762_v62  ;;  %v911_v46 = vsel %vm451_vm14, 1.0, %v1762_v62  ;;  %vm40_vm15 = vcmask 0  }
 0x208   :  { %v612_v43 = vsel %vm610_vm11, %v611_v0, %v609_v40  ;;  %v702_v28 = vadd.f32 %v688_v44, %v642_v32  ;;  %v716_v54 = vmul.f32 %v710_v3, %v703_v13  ;;  %41 = vst.msk [vmem:[#allocation2] sm:$0x1] %vm40_vm15, %v1762_v62  ;;  %42 = vst.msk [vmem:[#allocation4] sm:$0x1] %vm40_vm15, %v1762_v62 }
 0x209   :  { %v624_v23 = vmul.f32 %v612_v43, %v576_v41 }
 0x20a   :  { %v722_v21 = vmul.f32 %v911_v46, %v716_v54 }
 0x20b   :  { %v709_v14 = vmul.f32 %v624_v23, %v564_v63 }
 0x20c   :  { %v733_v11 = vsel %vm723_vm1, %v722_v21, 0.0 }
 0x20d   :  { %v715_v16 = vmul.f32 %v709_v14, %v702_v28 }
 0x20f   :  { %v721_v35 = vmul.f32 %v910_v56, %v715_v16  ;;  %v704_v37 = vld [vmem:[#allocation2] sm:$0x1]  ;;  %v796_v39 = vld [vmem:[#allocation4] sm:$0x1] }
 0x211   :  { %v731_v18 = vsel %vm723_vm1, %v721_v35, 0.0 }
 0x212   :  { %v732_v50 = vadd.f32 %v731_v18, %v730_v51 }
 0x214   :  { %v734_v27 = vadd.f32 %v733_v11, %v732_v50 }
 0x216   :  { %735 = vadd.xlane.f32.xlu0 %v734_v27 }
 0x21a   :  { %838 = vadd.xlane.f32.xlu0 %v1657_v1 }
 0x2a3   :  { %v736_v41 = vpop.xlane.xlu0 %735 }
 0x2a4   :  { %v737_v57 = vrot.slane %v736_v41, 4 }
 0x2a6   :  { %v738_v60 = vadd.f32 %v737_v57, %v736_v41 }
 0x2a7   :  { %v839_v7 = vpop.xlane.xlu0 %838 }
 0x2a8   :  { %v739_v26 = vrot.slane %v738_v60, 2  ;;  %v840_v2 = vrot.slane %v839_v7, 4 }
 0x2aa   :  { %v841_v29 = vadd.f32 %v840_v2, %v839_v7  ;;  %v740_v53 = vadd.f32 %v739_v26, %v738_v60 }
 0x2ac   :  { %v842_v10 = vrot.slane %v841_v29, 2  ;;  %v741_v52 = vrot.slane %v740_v53, 1 }
 0x2ae   :  { %v843_v38 = vadd.f32 %v842_v10, %v841_v29  ;;  %v742_v15 = vadd.f32 %v741_v52, %v740_v53 }
 0x2b0   :  { %988 = vpush %v742_v15  ;;  %v844_v1 = vrot.slane %v843_v38, 1 }
 0x2b2   :  { %v845_v17 = vadd.f32 %v844_v1, %v843_v38 }
 0x2b4   :  { %990 = vpush %v845_v17 }
 0x2e1   :  { %s989_s2 = spop %988 }
 0x2e2   :  { %v744_v62 = vstv %s989_s2 }
 0x2e3   :  { %v745_v48 = vadd.f32 %v744_v62, %v704_v37 }
 0x2e5   :  { %747 = vst.msk [vmem:[#allocation2] sm:$0x1] %vm40_vm15, %v745_v48  ;;  %s991_s16 = spop %990 }
 0x2e6   :  { %v847_v12 = vstv %s991_s16 }
 0x2e7   :  { %1054 = shalt.err (!%p1051_p4)
}
 0x2e8   :  { %s1055_s1 = scalar_lea.hbm %s1738_s9, 16 }
 0x2e9   :  { %p1056_p5 = scmp.ne.s32.totalorder %s1738_s9, %s1055_s1  ;;  %p1059_p6 = scmp.lt.u32.totalorder %s1055_s1, %s1738_s9 }
 0x2eb   :  { %p1061_p7 = pnand %p1059_p6, %p1056_p5 }
 0x2ed   :  { %1064 = shalt.err (!%p1061_p7)
}
 0x2ee   :  { %859 = dma.vmem_to_hbm [thread:$0]  %s857_s0, 16, %s1738_s9, [#allocation3]   ;;  %v848_v25 = vadd.f32 %v847_v12, %v796_v39 }
 0x2ef   :  { %s1065_s4 = scalar_lea.vmem %s867_s15, 16  ;;  %s1069_s6 = scalar_lea.vmem %s867_s15, 32 }
 0x2f0   :  { %849 = vst.msk [vmem:[#allocation4] sm:$0x1] %vm40_vm15, %v848_v25  ;;  %p1066_p8 = scmp.ne.s32.totalorder %s867_s15, %s1065_s4  ;;  %p1070_p9 = scmp.lt.s32.totalorder %s867_s15, %s867_s15 }
 0x2f1   :  { %p1071_p10 = scmp.lt.s32.totalorder %s1069_s6, %s1065_s4 }
 0x2f3   :  { %p1072_p11 = por %p1071_p10, %p1070_p9 }
 0x2f5   :  { %p1073_p12 = pnand %p1072_p11, %p1066_p8 }
 0x2f7   :  { %1076 = shalt.err (!%p1073_p12)
}
 0x2f8   :  { %s1077_s29 = scalar_lea.hbm %s1739_s10, 16 }
 0x2f9   :  { %p1078_p13 = scmp.ne.s32.totalorder %s1739_s10, %s1077_s29  ;;  %p1081_p0 = scmp.lt.u32.totalorder %s1077_s29, %s1739_s10 }
 0x2fb   :  { %p1083_p1 = pnand %p1081_p0, %p1078_p13 }
 0x2fd   :  { %1086 = shalt.err (!%p1083_p1)
}
 0x2fe   :  { %869 = dma.vmem_to_hbm [thread:$0]  %s867_s15, 16, %s1739_s10, [#allocation5]  }
 0x2ff   :  { %1087 = dma.done.wait [#allocation3], 16  }
 0x300   :  { %1088 = vsyncadd [#allocation3], 4294967280 }
 0x301   :  { %1089 = dma.done.wait [#allocation5], 16  }
 0x302   :  { %1090 = vsyncadd [#allocation5], 4294967280 }
 0x303   :  { %876 = vsyncpa [#allocation3], 1 }
 0x304   :  { %877 = vsyncpa [#allocation5], 1 }

</bundles_post_ra>
